<compile_context>
chip_gen: v7x
topology: tpu7x:2x2x1
jax: 0.10.0
libtpu: 0.0.40
codegen_flags: <defaults>
</compile_context>

<pallas_src>
import functools

import jax
import jax.numpy as jnp
from jax.experimental import pallas as pl
from jax.experimental.pallas import tpu as pltpu


def _fused_affine_kernel(x_ref, w_ref, b_ref, o_ref):
    # (bm, K) @ (K, C) + (1, C). The workload reads ~128 B of x per output element, so
    # it is memory-bound on every TPU generation; MXU/VPU utilization is free filler.
    acc = jnp.dot(x_ref[...], w_ref[...], preferred_element_type=jnp.float32)
    # Dropout(p=0.01) is identity at inference (already folded into the fusion).
    # TODO(synk): training-mode dropout needs unfused linears + a stateful PRNG mask.
    o_ref[...] = (acc + b_ref[...]).astype(o_ref.dtype)


def _round_up(x, m):
    return ((x + m - 1) // m) * m


_MIN_ROWS_FOR_TC_SPLIT = 2048  # below this the whole kernel is a few microseconds


@functools.partial(jax.jit, static_argnames=("block_rows",))
def mlp_forward(x, w1, b1, w2, b2, *, block_rows=8192):
    """Forward of MLP(dim, dim_hidden, n_hidden=2, dim_output, 'regression') at eval.

    x: (N, dim); w1: (dim, dim_hidden); b1: (1, dim_hidden);
    w2: (dim_hidden, dim_output); b2: (1, dim_output). Weights stored (in, out) so the
    math is x @ W + b (torch Linear semantics). The algebraic fusion is valid ONLY for
    this configuration (no nonlinearity between the two Linears; Dropout is identity
    at eval). f32 accumulation order differs from the reference at the ~1e-6 level.

    VMEM @ block_rows=8192: x tile = 8192*128*4 B = 4 MiB (8 MiB double-buffered) plus
    a ~128 KiB output tile — fits v5e's 16 MiB default scoped VMEM and leaves large
    headroom on v6e (32 MiB scoped) / v7x (32 MiB scoped of 64 MiB physical).
    """
    n, dim = x.shape
    dim_output = w2.shape[1]

    # --- Eval-time fusion of the two affine layers (dropout == identity) ---
    w_eff = w1 @ w2                               # (dim, dim_output)
    b_eff = (b1 @ w2 + b2).reshape(1, dim_output)

    # --- Pack `pack` consecutive samples into one 128-lane row when possible ---
    if dim <= 128 and 128 % dim == 0 and n % (128 // dim) == 0:
        pack = 128 // dim
    else:
        pack = 1                                   # fallback: natural (N, dim) rows

    if pack > 1:
        rows = n // pack
        k = pack * dim                             # == 128
        c = pack * dim_output
        x_in = x.reshape(rows, k)                  # free: contiguous row-major reshape
        # Block-diagonal fused weight: w_bd[a*dim + d, a*dim_output + o] = w_eff[d, o]
        eye = jnp.eye(pack, dtype=w_eff.dtype)
        w_in = jnp.einsum("ab,do->adbo", eye, w_eff).reshape(k, c)
        b_in = jnp.tile(b_eff, (1, pack))          # (1, c)
    else:
        rows, k, c = n, dim, dim_output
        x_in, w_in, b_in = x, w_eff, b_eff

    # --- Tile sizing: large contiguous x tiles; >= 2 grid steps when there is real
    #     work so the ("parallel",) axis feeds both v7x TensorCores. No padding:
    #     Pallas masks the ragged boundary block.
    bm = min(block_rows, _round_up(rows, 8))
    if rows > _MIN_ROWS_FOR_TC_SPLIT:
        bm = min(bm, _round_up(pl.cdiv(rows, 2), 8))
    grid = (pl.cdiv(rows, bm),)

    out = pl.pallas_call(
        _fused_affine_kernel,
        out_shape=jax.ShapeDtypeStruct((rows, c), x.dtype),
        grid_spec=pltpu.PrefetchScalarGridSpec(
            num_scalar_prefetch=0,
            grid=grid,
            in_specs=[
                pl.BlockSpec((bm, k), lambda i: (i, 0)),  # contiguous, lane-dense x tile
                pl.BlockSpec((k, c), lambda i: (0, 0)),   # fused (block-diag) weight, resident
                pl.BlockSpec((1, c), lambda i: (0, 0)),   # fused bias, resident
            ],
            out_specs=pl.BlockSpec((bm, c), lambda i: (i, 0)),
        ),
        compiler_params=pltpu.CompilerParams(
            dimension_semantics=("parallel",),    # megacore split of the row axis
        ),
    )(x_in, w_in, b_in)

    return out.reshape(n, dim_output)              # free reshape back to per-sample rows


def init_params(key, dim, dim_hidden=16, dim_output=1):
    """Deterministic PyTorch-style Linear init: U(-1/sqrt(fan_in), 1/sqrt(fan_in))."""
    k1, k2, k3, k4 = jax.random.split(key, 4)
    bound1 = 1.0 / jnp.sqrt(dim)
    bound2 = 1.0 / jnp.sqrt(dim_hidden)
    # stored pre-transposed: (in, out)
    w1 = jax.random.uniform(k1, (dim, dim_hidden), jnp.float32, -bound1, bound1)
    b1 = jax.random.uniform(k2, (1, dim_hidden), jnp.float32, -bound1, bound1)
    w2 = jax.random.uniform(k3, (dim_hidden, dim_output), jnp.float32, -bound2, bound2)
    b2 = jax.random.uniform(k4, (1, dim_output), jnp.float32, -bound2, bound2)
    return w1, b1, w2, b2


if __name__ == "__main__":
    key = jax.random.PRNGKey(0)
    kx, kp, kx2, kx3 = jax.random.split(key, 4)

    dim, dim_hidden, dim_output = 32, 16, 1
    w1, b1, w2, b2 = init_params(kp, dim, dim_hidden, dim_output)

    def ref_fn(xx):
        # plain-JAX reference (Dropout(0.01) is identity at eval; n_hidden=2 default)
        return (xx @ w1 + b1) @ w2 + b2

    # Small, module-consistent example: batch=8, dim=32 (packed path, single block).
    x = jax.random.normal(kx, (8, dim), jnp.float32)
    out = jax.block_until_ready(mlp_forward(x, w1, b1, w2, b2))
    assert out.shape == (8, dim_output)
    assert jnp.allclose(out, ref_fn(x), atol=1e-4, rtol=1e-4)

    # Ragged packed batch (rows=75): exercises boundary-block masking, no jnp.pad.
    x2 = jax.random.normal(kx2, (300, dim), jnp.float32)
    out2 = jax.block_until_ready(mlp_forward(x2, w1, b1, w2, b2))
    assert out2.shape == (300, dim_output)
    assert jnp.allclose(out2, ref_fn(x2), atol=1e-4, rtol=1e-4)

    # Batch not divisible by the pack factor: natural (N, dim) fallback path.
    x3 = jax.random.normal(kx3, (10, dim), jnp.float32)
    out3 = jax.block_until_ready(mlp_forward(x3, w1, b1, w2, b2))
    assert out3.shape == (10, dim_output)
    assert jnp.allclose(out3, ref_fn(x3), atol=1e-4, rtol=1e-4)

    # Multi-step grid + ragged tail inside the packed path (>= 2 grid steps).
    x4 = jax.random.normal(kx, (20000, dim), jnp.float32)
    out4 = jax.block_until_ready(mlp_forward(x4, w1, b1, w2, b2, block_rows=2048))
    assert out4.shape == (20000, dim_output)
    assert jnp.allclose(out4, ref_fn(x4), atol=1e-4, rtol=1e-4)

    # TODO(synk): n_hidden > 2 (SELU hidden stack) and task_type='binary' (Sigmoid)
    #             variants need an unfused, activation-aware kernel; not covered here.
    print("KERNEL_OK")
</pallas_src>

<mosaic_0001>
module attributes {stable_mosaic.version = 11 : i64} {
  func.func @_fused_affine_kernel(%arg0: i32, %arg1: memref<8x128xf32, #tpu.memory_space<vmem>>, %arg2: memref<128x4xf32, #tpu.memory_space<vmem>>, %arg3: memref<1x4xf32, #tpu.memory_space<vmem>>, %arg4: memref<8x4xf32, #tpu.memory_space<vmem>>) attributes {dimension_semantics = [#tpu.dimension_semantics<parallel>], iteration_bounds = array<i64: 1>, scalar_prefetch = 0 : i64, scratch_operands = 0 : i64, tpu.core_type = #tpu.core_type<tc>, window_params = [{transform_indices = @transform_0, window_bounds = array<i64: 8, 128>}, {pipeline_mode = #tpu.pipeline_mode<synchronous>, transform_indices = @transform_1, window_bounds = array<i64: 128, 4>}, {pipeline_mode = #tpu.pipeline_mode<synchronous>, transform_indices = @transform_2, window_bounds = array<i64: 1, 4>}, {transform_indices = @transform_3, window_bounds = array<i64: 8, 4>}]} {
    %c0 = arith.constant 0 : index
    %c0_0 = arith.constant 0 : index
    %0 = vector.load %arg1[%c0, %c0_0] : memref<8x128xf32, #tpu.memory_space<vmem>>, vector<8x128xf32>
    %c0_1 = arith.constant 0 : index
    %c0_2 = arith.constant 0 : index
    %1 = vector.load %arg2[%c0_1, %c0_2] : memref<128x4xf32, #tpu.memory_space<vmem>>, vector<128x4xf32>
    %cst = arith.constant dense<0.000000e+00> : vector<8x4xf32>
    %2 = tpu.matmul %0, %1, %cst {dimension_numbers = #tpu.dot_dimension_numbers<[1], [0], [0], [1], [0, 0, 1, 1], [], []>} : vector<8x128xf32>, vector<128x4xf32>, vector<8x4xf32> -> vector<8x4xf32>
    %c0_3 = arith.constant 0 : index
    %c0_4 = arith.constant 0 : index
    %3 = vector.load %arg3[%c0_3, %c0_4] : memref<1x4xf32, #tpu.memory_space<vmem>>, vector<1x4xf32>
    %4 = vector.broadcast %3 : vector<1x4xf32> to vector<8x4xf32>
    %5 = arith.addf %2, %4 : vector<8x4xf32>
    %c0_5 = arith.constant 0 : index
    %c0_6 = arith.constant 0 : index
    %6 = vector.load %arg4[%c0_5, %c0_6] : memref<8x4xf32, #tpu.memory_space<vmem>>, vector<8x4xf32>
    tpu.vector_store %arg4[%c0_5, %c0_6], %5 {strides = array<i32>} : memref<8x4xf32, #tpu.memory_space<vmem>>, vector<8x4xf32>,
    return
  }
  func.func @transform_0(%arg0: i32) -> (i32, i32) {
    %c0_i32 = arith.constant 0 : i32
    %c0_i32_0 = arith.constant 0 : i32
    return %arg0, %c0_i32 : i32, i32
  }
  func.func @transform_1(%arg0: i32) -> (i32, i32) {
    %c0_i32 = arith.constant 0 : i32
    %c0_i32_0 = arith.constant 0 : i32
    %c0_i32_1 = arith.constant 0 : i32
    return %c0_i32, %c0_i32_0 : i32, i32
  }
  func.func @transform_2(%arg0: i32) -> (i32, i32) {
    %c0_i32 = arith.constant 0 : i32
    %c0_i32_0 = arith.constant 0 : i32
    %c0_i32_1 = arith.constant 0 : i32
    return %c0_i32, %c0_i32_0 : i32, i32
  }
  func.func @transform_3(%arg0: i32) -> (i32, i32) {
    %c0_i32 = arith.constant 0 : i32
    %c0_i32_0 = arith.constant 0 : i32
    return %arg0, %c0_i32 : i32, i32
  }
}

</mosaic_0001>

<bundles_post_ra>
// kernel: mlp_forward.1
= control target key start
LH: loop header
LB: loop body
LE: loop exit
PB: predicated region body
PF: predicated region fallthrough
CT: control target
= control target key end

     0   :  { %v229_v3 = vmov 0.0|0.0   ;;  %vm230_vm0 = vmmov 0   ;;  %v231_v6 = vmov 0.0   ;;  %vm108_vm1 = vcmask 31744   ;;  %s309_s0 = inlined_call_operand.vmem [shape: f32[2,128], index: 0, kind: input, shape index: {}]   ;;  %s310_s1 = inlined_call_operand.vmem [shape: f32[128,4], index: 1, kind: input, shape index: {}]   ;;  %s311_s2 = inlined_call_operand.vmem [shape: f32[1,4], index: 2, kind: input, shape index: {}]   ;;  %s312_s3 = inlined_call_operand.vmem [shape: f32[2,4], index: 3, kind: output, shape index: {}]  }
   0x1   :  { %v15_v0 = vld [vmem:[%s310_s1] sm:$0xff]  ;;  %v16_v1 = vld [vmem:[%s310_s1 + $0x8] sm:$0xff]  ;;  %v17_v2 = vld [vmem:[%s310_s1 + $0x10] sm:$0xff]  ;;  %202 = vmatprep.subr.bf16.mxu0 %v229_v3  ;;  %199 = vmatprep.mubr.msk.f32.mxu0 %vm230_vm0, %v231_v6 }
   0x2   :  { %v203_v4 = vpack.c.bf16 %v16_v1, %v15_v0  ;;  %v18_v5 = vld [vmem:[%s310_s1 + $0x18] sm:$0xff]  ;;  %v19_v8 = vld [vmem:[%s310_s1 + $0x20] sm:$0xff]  ;;  %v20_v9 = vld [vmem:[%s310_s1 + $0x28] sm:$0xff] }
   0x3   :  { %v206_v7 = vpack.c.bf16 %v18_v5, %v17_v2  ;;  %v209_v10 = vpack.c.bf16 %v20_v9, %v19_v8  ;;  %v21_v11 = vld [vmem:[%s310_s1 + $0x30] sm:$0xff]  ;;  %v22_v12 = vld [vmem:[%s310_s1 + $0x38] sm:$0xff]  ;;  %v23_v14 = vld [vmem:[%s310_s1 + $0x40] sm:$0xff] }
   0x4   :  { %204 = vmatpush3.bf16.msra.mxu0 %v203_v4  ;;  %v212_v13 = vpack.c.bf16 %v22_v12, %v21_v11  ;;  %v24_v15 = vld [vmem:[%s310_s1 + $0x48] sm:$0xff]  ;;  %v25_v17 = vld [vmem:[%s310_s1 + $0x50] sm:$0xff]  ;;  %v26_v18 = vld [vmem:[%s310_s1 + $0x58] sm:$0xff] }
   0x5   :  { %205 = vmatprep.subr.bf16.mxu0 %v229_v3  ;;  %v215_v16 = vpack.c.bf16 %v24_v15, %v23_v14  ;;  %v218_v19 = vpack.c.bf16 %v26_v18, %v25_v17  ;;  %v27_v20 = vld [vmem:[%s310_s1 + $0x60] sm:$0xff]  ;;  %v28_v21 = vld [vmem:[%s310_s1 + $0x68] sm:$0xff]  ;;  %v29_v23 = vld [vmem:[%s310_s1 + $0x70] sm:$0xff] }
   0x6   :  { %v221_v22 = vpack.c.bf16 %v28_v21, %v27_v20  ;;  %v30_v24 = vld [vmem:[%s310_s1 + $0x78] sm:$0xff]  ;;  %v14_v26 = vld [vmem:[%s309_s0] sm:$0xff] }
   0x7   :  { %v224_v25 = vpack.c.bf16 %v30_v24, %v29_v23  ;;  %v149_v27 = vld [vmem:[%s311_s2] ss:$0 sm:$0xff] }
   0x8   :  { %207 = vmatpush3.bf16.msra.mxu0 %v206_v7 }
   0x9   :  { %208 = vmatprep.subr.bf16.mxu0 %v229_v3 }
   0xc   :  { %210 = vmatpush3.bf16.msra.mxu0 %v209_v10 }
   0xd   :  { %211 = vmatprep.subr.bf16.mxu0 %v229_v3 }
  0x10   :  { %213 = vmatpush3.bf16.msra.mxu0 %v212_v13 }
  0x11   :  { %214 = vmatprep.subr.bf16.mxu0 %v229_v3 }
  0x14   :  { %216 = vmatpush3.bf16.msra.mxu0 %v215_v16 }
  0x15   :  { %217 = vmatprep.subr.bf16.mxu0 %v229_v3 }
  0x18   :  { %219 = vmatpush3.bf16.msra.mxu0 %v218_v19 }
  0x19   :  { %220 = vmatprep.subr.bf16.mxu0 %v229_v3 }
  0x1c   :  { %222 = vmatpush3.bf16.msra.mxu0 %v221_v22 }
  0x1d   :  { %223 = vmatprep.subr.bf16.mxu0 %v229_v3 }
  0x20   :  { %225 = vmatpush3.bf16.msra.mxu0 %v224_v25 }
  0x23   :  { %200 = vmatmul.mubr.f32.vlgmr.msra.gmra.mrb[0].mxu0 %v14_v26 }
  0xf6   :  { %v104_v28 = vpop.f32.mrb[0].mxu0 }
  0xf7   :  { %v105_v29 = vadd.f32 %v149_v27, %v104_v28  ;;  %v201_v30 = vpop.f32.mrb[1].mxu0 }
  0xf9   :  { %109 = vst.msk [vmem:[#allocation2] sm:$0xff] %vm108_vm1, %v105_v29 }
 0x100   :  { %v127_v31 = vld [vmem:[#allocation2] sm:$0x3] }
 0x101   :  { %128 = vst [vmem:[%s312_s3] sm:$0x3] %v127_v31 }

</bundles_post_ra>
